<compile_context>
chip_gen: v6e
topology: v6e:2x2x1
jax: 0.10.0
libtpu: 0.0.40
codegen_flags: <defaults>
</compile_context>

<pallas_src>
import numpy as np
import jax
import jax.numpy as jnp
from jax import lax
from jax.experimental import pallas as pl
from jax.experimental.pallas import tpu as pltpu


def dblock_kernel(xp_ref, c_ref, b1_ref, d_ref, ms_ref, bo_ref, out_ref,
                  xpp, hpp):
    BT, Hh, L1 = xp_ref.shape          # images per step, H//2, 2*W*Cin
    L2 = hpp.shape[2]                  # 2*W*Cout
    M = BT * Hh
    f32 = jnp.float32

    x = xp_ref[...].astype(f32)                          # (BT, Hh, L1) paired rows

    # ---- shortcut: (avgpool2x2 o conv1x1) fused into ONE contiguous matmul ----
    acc = jnp.dot(x.reshape(M, L1), ms_ref[...], preferred_element_type=f32)

    # ---- main stage 1: relu(x) -> conv1 (3x3 SAME) as 3 contiguous paired-row
    #      band matmuls (K=L1, N=L2).  Only the two halo paired-rows are zeroed;
    #      the interior is fully overwritten every step, so a megacore-sharded
    #      'parallel' grid stays correct.  W-side zero padding lives inside the
    #      band matrices, so no padded columns exist at all. ----
    xpp[:, 0:1, :] = jnp.zeros((BT, 1, L1), f32)
    xpp[:, Hh + 1:Hh + 2, :] = jnp.zeros((BT, 1, L1), f32)
    xpp[:, 1:Hh + 1, :] = jnp.maximum(x, 0.0)
    h1 = jnp.dot(xpp[:, 0:Hh, :].reshape(M, L1), c_ref[0],
                 preferred_element_type=f32)
    h1 = h1 + jnp.dot(xpp[:, 1:Hh + 1, :].reshape(M, L1), c_ref[1],
                      preferred_element_type=f32)
    h1 = h1 + jnp.dot(xpp[:, 2:Hh + 2, :].reshape(M, L1), c_ref[2],
                      preferred_element_type=f32)
    h1 = jnp.maximum(h1 + b1_ref[...], 0.0)              # bias + second relu

    # ---- main stage 2: (avgpool2x2 o conv2 3x3) == effective 4x4 stride-2 kernel,
    #      as 3 contiguous paired-row band matmuls (K=L2, N=Wh*Cout). ----
    hpp[:, 0:1, :] = jnp.zeros((BT, 1, L2), f32)
    hpp[:, Hh + 1:Hh + 2, :] = jnp.zeros((BT, 1, L2), f32)
    hpp[:, 1:Hh + 1, :] = h1.reshape(BT, Hh, L2)
    acc = acc + jnp.dot(hpp[:, 0:Hh, :].reshape(M, L2), d_ref[0],
                        preferred_element_type=f32)
    acc = acc + jnp.dot(hpp[:, 1:Hh + 1, :].reshape(M, L2), d_ref[1],
                        preferred_element_type=f32)
    acc = acc + jnp.dot(hpp[:, 2:Hh + 2, :].reshape(M, L2), d_ref[2],
                        preferred_element_type=f32)

    # One lane-dense-as-possible slab store (Wh*Cout lanes; >=128 at real widths).
    out_ref[...] = (acc + bo_ref[...]).astype(out_ref.dtype)


# Padded source row (2*r_out + k), k in [0,4), lives in scratch paired-row
# (r_out + s) at slot sigma, with k = 2*s - 1 + sigma.
_K_TO_BAND_SLOT = ((0, 1), (1, 0), (1, 1), (2, 0))


def prepare_dblock_weights(w1, b1, w2, b2, ws, bs, H, W):
    """One-time host-side (NumPy) re-layout of DBlock weights into paired-row band
    matrices.  Hoisted out of the jitted forward (no per-call device scatters)."""
    w1 = np.asarray(w1, np.float32)
    w2 = np.asarray(w2, np.float32)
    ws = np.asarray(ws, np.float32)
    b1 = np.asarray(b1, np.float32).reshape(-1)
    b2 = np.asarray(b2, np.float32).reshape(-1)
    bs = np.asarray(bs, np.float32).reshape(-1)
    Cin, Cout = w1.shape[2], w1.shape[3]
    Wh = W // 2
    L1, L2, No = 2 * W * Cin, 2 * W * Cout, Wh * Cout

    # conv1 (3x3 SAME), paired-row form: h1_pair[r] = sum_s xpp[r+s] @ C[s].
    C = np.zeros((3, L1, L2), np.float32)
    for p in range(2):                      # output sub-row within the pair
        for dy in range(3):
            s, sig = _K_TO_BAND_SLOT[p + dy]
            for dx in range(3):
                for xo in range(W):
                    xi = xo + dx - 1
                    if 0 <= xi < W:         # W-side zero padding folded in
                        r0 = sig * W * Cin + xi * Cin
                        c0 = p * W * Cout + xo * Cout
                        C[s, r0:r0 + Cin, c0:c0 + Cout] += w1[dy, dx]

    # (avgpool2x2 o conv2 3x3) == effective 4x4 stride-2 kernel (0.25 folded in).
    w2eff = np.zeros((4, 4, Cout, Cout), np.float32)
    for p in range(2):
        for q in range(2):
            w2eff[p:p + 3, q:q + 3] += 0.25 * w2
    D = np.zeros((3, L2, No), np.float32)
    for ky in range(4):
        s, sig = _K_TO_BAND_SLOT[ky]
        for kx in range(4):
            for j in range(Wh):
                xi = 2 * j + kx - 1
                if 0 <= xi < W:
                    r0 = sig * W * Cout + xi * Cout
                    c0 = j * Cout
                    D[s, r0:r0 + Cout, c0:c0 + Cout] += w2eff[ky, kx]

    # shortcut: (avgpool2x2 o conv1x1) fused into one (L1, No) matrix.
    Ms = np.zeros((L1, No), np.float32)
    for p in range(2):
        for q in range(2):
            for j in range(Wh):
                r0 = p * W * Cin + (2 * j + q) * Cin
                c0 = j * Cout
                Ms[r0:r0 + Cin, c0:c0 + Cout] += 0.25 * ws

    b1row = np.tile(b1.reshape(1, Cout), (1, 2 * W))         # (1, L2)
    borow = np.tile((b2 + bs).reshape(1, Cout), (1, Wh))     # (1, No) post-pool bias

    return dict(C=jnp.asarray(C), b1row=jnp.asarray(b1row), D=jnp.asarray(D),
                Ms=jnp.asarray(Ms), borow=jnp.asarray(borow))


def _pick_block_batch(B, Hh):
    """Images per grid step: prefer >=128 matmul rows per step (MXU sublane fill);
    if nothing reaches it, take the whole batch (one well-filled step beats several
    overhead-dominated ones).  If halving still reaches 128 rows, halve so v7x's
    two TensorCores each get a grid step."""
    divisors = [d for d in range(1, B + 1) if B % d == 0]
    bt = next((d for d in divisors if d * Hh >= 128), B)
    if B // bt < 2 and bt % 2 == 0 and (bt // 2) * Hh >= 128:
        bt //= 2
    return bt


@jax.jit
def dblock_forward(x_nhwc, C, b1row, D, Ms, borow):
    B, H, W, Cin = x_nhwc.shape
    assert H % 2 == 0 and W % 2 == 0, "2x2 avg-pool needs even spatial dims"
    Hh, Wh = H // 2, W // 2
    L1 = 2 * W * Cin
    L2 = b1row.shape[1]
    No = borow.shape[1]
    Cout = No // Wh
    BT = _pick_block_batch(B, Hh)
    M = BT * Hh

    # Paired-row, lane-dense input layout: row r of image b holds the two source
    # rows (2r, 2r+1) as 2*W*Cin lanes.  Free, contiguous reshape.
    xp = x_nhwc.reshape(B, Hh, L1)

    flops = 2 * B * Hh * (L1 * No + 3 * L1 * L2 + 3 * L2 * No)
    bytes_accessed = 4 * (B * Hh * (L1 + No)
                          + C.size + D.size + Ms.size + b1row.size + borow.size)

    out2d = pl.pallas_call(
        dblock_kernel,
        out_shape=jax.ShapeDtypeStruct((B * Hh, No), x_nhwc.dtype),
        grid=(B // BT,),
        in_specs=[
            pl.BlockSpec((BT, Hh, L1), lambda b: (b, 0, 0)),   # paired x
            pl.BlockSpec((3, L1, L2), lambda b: (0, 0, 0)),    # conv1 bands (VMEM-resident)
            pl.BlockSpec((1, L2), lambda b: (0, 0)),           # b1 (pre-relu)
            pl.BlockSpec((3, L2, No), lambda b: (0, 0, 0)),    # conv2∘pool bands
            pl.BlockSpec((L1, No), lambda b: (0, 0)),          # shortcut matrix
            pl.BlockSpec((1, No), lambda b: (0, 0)),           # b2 + bs (post-pool)
        ],
        out_specs=pl.BlockSpec((M, No), lambda b: (b, 0)),
        scratch_shapes=[
            pltpu.VMEM((BT, Hh + 2, L1), jnp.float32),   # paired relu(x) + row halos
            pltpu.VMEM((BT, Hh + 2, L2), jnp.float32),   # paired relu(conv1) + row halos
        ],
        compiler_params=pltpu.CompilerParams(
            dimension_semantics=("parallel",),
            vmem_limit_bytes=32 * 1024 * 1024),
        cost_estimate=pl.CostEstimate(flops=flops, transcendentals=0,
                                      bytes_accessed=bytes_accessed),
    )(xp, C, b1row, D, Ms, borow)

    return out2d.reshape(B, Hh, Wh, Cout)


def dblock_reference(x_nhwc, w1, b1, w2, b2, ws, bs):
    """Pure-JAX reference of the same forward pass (NHWC)."""
    dn = ('NHWC', 'HWIO', 'NHWC')

    def conv(a, w, pad):
        return lax.conv_general_dilated(a, w, (1, 1), pad, dimension_numbers=dn)

    def pool(a):
        s = lax.reduce_window(a, 0.0, lax.add, (1, 2, 2, 1), (1, 2, 2, 1), 'VALID')
        return s * 0.25

    h = jnp.maximum(x_nhwc, 0.0)
    h = conv(h, w1, 'SAME') + b1
    h = jnp.maximum(h, 0.0)
    h = conv(h, w2, 'SAME') + b2
    h = pool(h)
    sc = conv(x_nhwc, ws.reshape(1, 1, *ws.shape), 'VALID') + bs
    sc = pool(sc)
    return h + sc


if __name__ == "__main__":
    B, Cin, Cout, H, W = 2, 4, 8, 16, 16
    keys = jax.random.split(jax.random.PRNGKey(0), 7)

    # Input in the module's native NCHW layout.
    x_nchw = jax.random.normal(keys[0], (B, Cin, H, W), jnp.float32)

    # Deterministic synthetic parameters (SNConv == conv with bias at forward time).
    w1 = 0.1 * jax.random.normal(keys[1], (3, 3, Cin, Cout), jnp.float32)
    b1 = 0.1 * jax.random.normal(keys[2], (1, 1, Cout), jnp.float32)
    w2 = 0.1 * jax.random.normal(keys[3], (3, 3, Cout, Cout), jnp.float32)
    b2 = 0.1 * jax.random.normal(keys[4], (1, 1, Cout), jnp.float32)
    ws = 0.1 * jax.random.normal(keys[5], (Cin, Cout), jnp.float32)   # 1x1 conv
    bs = 0.1 * jax.random.normal(keys[6], (1, 1, Cout), jnp.float32)

    x_nhwc = jnp.transpose(x_nchw, (0, 2, 3, 1))   # NCHW -> NHWC

    # One-time host-side weight re-layout, hoisted out of the per-call path.
    P = prepare_dblock_weights(w1, b1, w2, b2, ws, bs, H, W)

    out = dblock_forward(x_nhwc, P["C"], P["b1row"], P["D"], P["Ms"], P["borow"])
    out = jax.block_until_ready(out)

    ref = dblock_reference(x_nhwc, w1, b1, w2, b2, ws, bs)
    assert out.shape == (B, H // 2, W // 2, Cout), out.shape
    max_err = float(jnp.max(jnp.abs(out - ref)))
    assert jnp.allclose(out, ref, atol=1e-4, rtol=1e-4), max_err

    print("KERNEL_OK")
</pallas_src>

<mosaic_0001>
module attributes {stable_mosaic.version = 11 : i64} {
  func.func @dblock_kernel(%arg0: i32, %arg1: memref<2x8x128xf32, #tpu.memory_space<vmem>>, %arg2: memref<3x128x256xf32, #tpu.memory_space<vmem>>, %arg3: memref<1x256xf32, #tpu.memory_space<vmem>>, %arg4: memref<3x256x64xf32, #tpu.memory_space<vmem>>, %arg5: memref<128x64xf32, #tpu.memory_space<vmem>>, %arg6: memref<1x64xf32, #tpu.memory_space<vmem>>, %arg7: memref<16x64xf32, #tpu.memory_space<vmem>>, %arg8: memref<2x10x128xf32, #tpu.memory_space<vmem>>, %arg9: memref<2x10x256xf32, #tpu.memory_space<vmem>>) attributes {dimension_semantics = [#tpu.dimension_semantics<parallel>], iteration_bounds = array<i64: 1>, scalar_prefetch = 0 : i64, scratch_operands = 2 : i64, tpu.core_type = #tpu.core_type<tc>, window_params = [{transform_indices = @transform_0, window_bounds = array<i64: 2, 8, 128>}, {pipeline_mode = #tpu.pipeline_mode<synchronous>, transform_indices = @transform_1, window_bounds = array<i64: 3, 128, 256>}, {pipeline_mode = #tpu.pipeline_mode<synchronous>, transform_indices = @transform_2, window_bounds = array<i64: 1, 256>}, {pipeline_mode = #tpu.pipeline_mode<synchronous>, transform_indices = @transform_3, window_bounds = array<i64: 3, 256, 64>}, {pipeline_mode = #tpu.pipeline_mode<synchronous>, transform_indices = @transform_4, window_bounds = array<i64: 128, 64>}, {pipeline_mode = #tpu.pipeline_mode<synchronous>, transform_indices = @transform_5, window_bounds = array<i64: 1, 64>}, {transform_indices = @transform_6, window_bounds = array<i64: 16, 64>}]} {
    %c0 = arith.constant 0 : index
    %c0_0 = arith.constant 0 : index
    %c0_1 = arith.constant 0 : index
    %0 = vector.load %arg1[%c0, %c0_0, %c0_1] : memref<2x8x128xf32, #tpu.memory_space<vmem>>, vector<2x8x128xf32>
    %1 = vector.shape_cast %0 : vector<2x8x128xf32> to vector<16x128xf32>
    %c0_2 = arith.constant 0 : index
    %c0_3 = arith.constant 0 : index
    %2 = vector.load %arg5[%c0_2, %c0_3] : memref<128x64xf32, #tpu.memory_space<vmem>>, vector<128x64xf32>
    %cst = arith.constant dense<0.000000e+00> : vector<16x64xf32>
    %3 = tpu.matmul %1, %2, %cst {dimension_numbers = #tpu.dot_dimension_numbers<[1], [0], [0], [1], [0, 0, 1, 1], [], []>} : vector<16x128xf32>, vector<128x64xf32>, vector<16x64xf32> -> vector<16x64xf32>
    %cst_4 = arith.constant 0.000000e+00 : f32
    %4 = vector.broadcast %cst_4 : f32 to vector<2x1x128xf32>
    %c0_5 = arith.constant 0 : index
    %c0_6 = arith.constant 0 : index
    %c0_7 = arith.constant 0 : index
    %5 = vector.load %arg8[%c0_5, %c0_6, %c0_7] : memref<2x10x128xf32, #tpu.memory_space<vmem>>, vector<2x1x128xf32>
    tpu.vector_store %arg8[%c0_5, %c0_6, %c0_7], %4 {strides = array<i32>} : memref<2x10x128xf32, #tpu.memory_space<vmem>>, vector<2x1x128xf32>,
    %cst_8 = arith.constant 0.000000e+00 : f32
    %6 = vector.broadcast %cst_8 : f32 to vector<2x1x128xf32>
    %c0_9 = arith.constant 0 : index
    %c9 = arith.constant 9 : index
    %c0_10 = arith.constant 0 : index
    %7 = vector.load %arg8[%c0_9, %c9, %c0_10] : memref<2x10x128xf32, #tpu.memory_space<vmem>>, vector<2x1x128xf32>
    tpu.vector_store %arg8[%c0_9, %c9, %c0_10], %6 {strides = array<i32>} : memref<2x10x128xf32, #tpu.memory_space<vmem>>, vector<2x1x128xf32>,
    %cst_11 = arith.constant 0.000000e+00 : f32
    %8 = vector.broadcast %cst_11 : f32 to vector<2x8x128xf32>
    %9 = arith.maximumf %0, %8 : vector<2x8x128xf32>
    %c0_12 = arith.constant 0 : index
    %c1 = arith.constant 1 : index
    %c0_13 = arith.constant 0 : index
    %10 = vector.load %arg8[%c0_12, %c1, %c0_13] : memref<2x10x128xf32, #tpu.memory_space<vmem>>, vector<2x8x128xf32>
    tpu.vector_store %arg8[%c0_12, %c1, %c0_13], %9 {strides = array<i32>} : memref<2x10x128xf32, #tpu.memory_space<vmem>>, vector<2x8x128xf32>,
    %c0_14 = arith.constant 0 : index
    %c0_15 = arith.constant 0 : index
    %c0_16 = arith.constant 0 : index
    %11 = vector.load %arg8[%c0_14, %c0_15, %c0_16] : memref<2x10x128xf32, #tpu.memory_space<vmem>>, vector<2x8x128xf32>
    %12 = vector.shape_cast %11 : vector<2x8x128xf32> to vector<16x128xf32>
    %c0_17 = arith.constant 0 : index
    %c0_18 = arith.constant 0 : index
    %c0_19 = arith.constant 0 : index
    %13 = vector.load %arg2[%c0_17, %c0_18, %c0_19] : memref<3x128x256xf32, #tpu.memory_space<vmem>>, vector<1x128x256xf32>
    %14 = vector.shape_cast %13 : vector<1x128x256xf32> to vector<128x256xf32>
    %cst_20 = arith.constant dense<0.000000e+00> : vector<16x256xf32>
    %15 = tpu.matmul %12, %14, %cst_20 {dimension_numbers = #tpu.dot_dimension_numbers<[1], [0], [0], [1], [0, 0, 1, 1], [], []>} : vector<16x128xf32>, vector<128x256xf32>, vector<16x256xf32> -> vector<16x256xf32>
    %c0_21 = arith.constant 0 : index
    %c1_22 = arith.constant 1 : index
    %c0_23 = arith.constant 0 : index
    %16 = vector.load %arg8[%c0_21, %c1_22, %c0_23] : memref<2x10x128xf32, #tpu.memory_space<vmem>>, vector<2x8x128xf32>
    %17 = vector.shape_cast %16 : vector<2x8x128xf32> to vector<16x128xf32>
    %c1_24 = arith.constant 1 : index
    %c0_25 = arith.constant 0 : index
    %c0_26 = arith.constant 0 : index
    %18 = vector.load %arg2[%c1_24, %c0_25, %c0_26] : memref<3x128x256xf32, #tpu.memory_space<vmem>>, vector<1x128x256xf32>
    %19 = vector.shape_cast %18 : vector<1x128x256xf32> to vector<128x256xf32>
    %cst_27 = arith.constant dense<0.000000e+00> : vector<16x256xf32>
    %20 = tpu.matmul %17, %19, %cst_27 {dimension_numbers = #tpu.dot_dimension_numbers<[1], [0], [0], [1], [0, 0, 1, 1], [], []>} : vector<16x128xf32>, vector<128x256xf32>, vector<16x256xf32> -> vector<16x256xf32>
    %21 = arith.addf %15, %20 : vector<16x256xf32>
    %c0_28 = arith.constant 0 : index
    %c2 = arith.constant 2 : index
    %c0_29 = arith.constant 0 : index
    %22 = vector.load %arg8[%c0_28, %c2, %c0_29] : memref<2x10x128xf32, #tpu.memory_space<vmem>>, vector<2x8x128xf32>
    %23 = vector.shape_cast %22 : vector<2x8x128xf32> to vector<16x128xf32>
    %c2_30 = arith.constant 2 : index
    %c0_31 = arith.constant 0 : index
    %c0_32 = arith.constant 0 : index
    %24 = vector.load %arg2[%c2_30, %c0_31, %c0_32] : memref<3x128x256xf32, #tpu.memory_space<vmem>>, vector<1x128x256xf32>
    %25 = vector.shape_cast %24 : vector<1x128x256xf32> to vector<128x256xf32>
    %cst_33 = arith.constant dense<0.000000e+00> : vector<16x256xf32>
    %26 = tpu.matmul %23, %25, %cst_33 {dimension_numbers = #tpu.dot_dimension_numbers<[1], [0], [0], [1], [0, 0, 1, 1], [], []>} : vector<16x128xf32>, vector<128x256xf32>, vector<16x256xf32> -> vector<16x256xf32>
    %27 = arith.addf %21, %26 : vector<16x256xf32>
    %c0_34 = arith.constant 0 : index
    %c0_35 = arith.constant 0 : index
    %28 = vector.load %arg3[%c0_34, %c0_35] : memref<1x256xf32, #tpu.memory_space<vmem>>, vector<1x256xf32>
    %29 = vector.broadcast %28 : vector<1x256xf32> to vector<16x256xf32>
    %30 = arith.addf %27, %29 : vector<16x256xf32>
    %cst_36 = arith.constant 0.000000e+00 : f32
    %31 = vector.broadcast %cst_36 : f32 to vector<16x256xf32>
    %32 = arith.maximumf %30, %31 : vector<16x256xf32>
    %cst_37 = arith.constant 0.000000e+00 : f32
    %33 = vector.broadcast %cst_37 : f32 to vector<2x1x256xf32>
    %c0_38 = arith.constant 0 : index
    %c0_39 = arith.constant 0 : index
    %c0_40 = arith.constant 0 : index
    %34 = vector.load %arg9[%c0_38, %c0_39, %c0_40] : memref<2x10x256xf32, #tpu.memory_space<vmem>>, vector<2x1x256xf32>
    tpu.vector_store %arg9[%c0_38, %c0_39, %c0_40], %33 {strides = array<i32>} : memref<2x10x256xf32, #tpu.memory_space<vmem>>, vector<2x1x256xf32>,
    %cst_41 = arith.constant 0.000000e+00 : f32
    %35 = vector.broadcast %cst_41 : f32 to vector<2x1x256xf32>
    %c0_42 = arith.constant 0 : index
    %c9_43 = arith.constant 9 : index
    %c0_44 = arith.constant 0 : index
    %36 = vector.load %arg9[%c0_42, %c9_43, %c0_44] : memref<2x10x256xf32, #tpu.memory_space<vmem>>, vector<2x1x256xf32>
    tpu.vector_store %arg9[%c0_42, %c9_43, %c0_44], %35 {strides = array<i32>} : memref<2x10x256xf32, #tpu.memory_space<vmem>>, vector<2x1x256xf32>,
    %37 = vector.shape_cast %32 : vector<16x256xf32> to vector<2x8x256xf32>
    %c0_45 = arith.constant 0 : index
    %c1_46 = arith.constant 1 : index
    %c0_47 = arith.constant 0 : index
    %38 = vector.load %arg9[%c0_45, %c1_46, %c0_47] : memref<2x10x256xf32, #tpu.memory_space<vmem>>, vector<2x8x256xf32>
    tpu.vector_store %arg9[%c0_45, %c1_46, %c0_47], %37 {strides = array<i32>} : memref<2x10x256xf32, #tpu.memory_space<vmem>>, vector<2x8x256xf32>,
    %c0_48 = arith.constant 0 : index
    %c0_49 = arith.constant 0 : index
    %c0_50 = arith.constant 0 : index
    %39 = vector.load %arg9[%c0_48, %c0_49, %c0_50] : memref<2x10x256xf32, #tpu.memory_space<vmem>>, vector<2x8x256xf32>
    %40 = vector.shape_cast %39 : vector<2x8x256xf32> to vector<16x256xf32>
    %c0_51 = arith.constant 0 : index
    %c0_52 = arith.constant 0 : index
    %c0_53 = arith.constant 0 : index
    %41 = vector.load %arg4[%c0_51, %c0_52, %c0_53] : memref<3x256x64xf32, #tpu.memory_space<vmem>>, vector<1x256x64xf32>
    %42 = vector.shape_cast %41 : vector<1x256x64xf32> to vector<256x64xf32>
    %cst_54 = arith.constant dense<0.000000e+00> : vector<16x64xf32>
    %43 = tpu.matmul %40, %42, %cst_54 {dimension_numbers = #tpu.dot_dimension_numbers<[1], [0], [0], [1], [0, 0, 1, 1], [], []>} : vector<16x256xf32>, vector<256x64xf32>, vector<16x64xf32> -> vector<16x64xf32>
    %44 = arith.addf %3, %43 : vector<16x64xf32>
    %c0_55 = arith.constant 0 : index
    %c1_56 = arith.constant 1 : index
    %c0_57 = arith.constant 0 : index
    %45 = vector.load %arg9[%c0_55, %c1_56, %c0_57] : memref<2x10x256xf32, #tpu.memory_space<vmem>>, vector<2x8x256xf32>
    %46 = vector.shape_cast %45 : vector<2x8x256xf32> to vector<16x256xf32>
    %c1_58 = arith.constant 1 : index
    %c0_59 = arith.constant 0 : index
    %c0_60 = arith.constant 0 : index
    %47 = vector.load %arg4[%c1_58, %c0_59, %c0_60] : memref<3x256x64xf32, #tpu.memory_space<vmem>>, vector<1x256x64xf32>
    %48 = vector.shape_cast %47 : vector<1x256x64xf32> to vector<256x64xf32>
    %cst_61 = arith.constant dense<0.000000e+00> : vector<16x64xf32>
    %49 = tpu.matmul %46, %48, %cst_61 {dimension_numbers = #tpu.dot_dimension_numbers<[1], [0], [0], [1], [0, 0, 1, 1], [], []>} : vector<16x256xf32>, vector<256x64xf32>, vector<16x64xf32> -> vector<16x64xf32>
    %50 = arith.addf %44, %49 : vector<16x64xf32>
    %c0_62 = arith.constant 0 : index
    %c2_63 = arith.constant 2 : index
    %c0_64 = arith.constant 0 : index
    %51 = vector.load %arg9[%c0_62, %c2_63, %c0_64] : memref<2x10x256xf32, #tpu.memory_space<vmem>>, vector<2x8x256xf32>
    %52 = vector.shape_cast %51 : vector<2x8x256xf32> to vector<16x256xf32>
    %c2_65 = arith.constant 2 : index
    %c0_66 = arith.constant 0 : index
    %c0_67 = arith.constant 0 : index
    %53 = vector.load %arg4[%c2_65, %c0_66, %c0_67] : memref<3x256x64xf32, #tpu.memory_space<vmem>>, vector<1x256x64xf32>
    %54 = vector.shape_cast %53 : vector<1x256x64xf32> to vector<256x64xf32>
    %cst_68 = arith.constant dense<0.000000e+00> : vector<16x64xf32>
    %55 = tpu.matmul %52, %54, %cst_68 {dimension_numbers = #tpu.dot_dimension_numbers<[1], [0], [0], [1], [0, 0, 1, 1], [], []>} : vector<16x256xf32>, vector<256x64xf32>, vector<16x64xf32> -> vector<16x64xf32>
    %56 = arith.addf %50, %55 : vector<16x64xf32>
    %c0_69 = arith.constant 0 : index
    %c0_70 = arith.constant 0 : index
    %57 = vector.load %arg6[%c0_69, %c0_70] : memref<1x64xf32, #tpu.memory_space<vmem>>, vector<1x64xf32>
    %58 = vector.broadcast %57 : vector<1x64xf32> to vector<16x64xf32>
    %59 = arith.addf %56, %58 : vector<16x64xf32>
    %c0_71 = arith.constant 0 : index
    %c0_72 = arith.constant 0 : index
    %60 = vector.load %arg7[%c0_71, %c0_72] : memref<16x64xf32, #tpu.memory_space<vmem>>, vector<16x64xf32>
    tpu.vector_store %arg7[%c0_71, %c0_72], %59 {strides = array<i32>} : memref<16x64xf32, #tpu.memory_space<vmem>>, vector<16x64xf32>,
    return
  }
  func.func @transform_0(%arg0: i32) -> (i32, i32, i32) {
    %c0_i32 = arith.constant 0 : i32
    %c0_i32_0 = arith.constant 0 : i32
    %c0_i32_1 = arith.constant 0 : i32
    return %arg0, %c0_i32, %c0_i32_0 : i32, i32, i32
  }
  func.func @transform_1(%arg0: i32) -> (i32, i32, i32) {
    %c0_i32 = arith.constant 0 : i32
    %c0_i32_0 = arith.constant 0 : i32
    %c0_i32_1 = arith.constant 0 : i32
    %c0_i32_2 = arith.constant 0 : i32
    return %c0_i32, %c0_i32_0, %c0_i32_1 : i32, i32, i32
  }
  func.func @transform_2(%arg0: i32) -> (i32, i32) {
    %c0_i32 = arith.constant 0 : i32
    %c0_i32_0 = arith.constant 0 : i32
    %c0_i32_1 = arith.constant 0 : i32
    return %c0_i32, %c0_i32_0 : i32, i32
  }
  func.func @transform_3(%arg0: i32) -> (i32, i32, i32) {
    %c0_i32 = arith.constant 0 : i32
    %c0_i32_0 = arith.constant 0 : i32
    %c0_i32_1 = arith.constant 0 : i32
    %c0_i32_2 = arith.constant 0 : i32
    return %c0_i32, %c0_i32_0, %c0_i32_1 : i32, i32, i32
  }
  func.func @transform_4(%arg0: i32) -> (i32, i32) {
    %c0_i32 = arith.constant 0 : i32
    %c0_i32_0 = arith.constant 0 : i32
    %c0_i32_1 = arith.constant 0 : i32
    return %c0_i32, %c0_i32_0 : i32, i32
  }
  func.func @transform_5(%arg0: i32) -> (i32, i32) {
    %c0_i32 = arith.constant 0 : i32
    %c0_i32_0 = arith.constant 0 : i32
    %c0_i32_1 = arith.constant 0 : i32
    return %c0_i32, %c0_i32_0 : i32, i32
  }
  func.func @transform_6(%arg0: i32) -> (i32, i32) {
    %c0_i32 = arith.constant 0 : i32
    %c0_i32_0 = arith.constant 0 : i32
    return %arg0, %c0_i32 : i32, i32
  }
}

</mosaic_0001>

<bundles_post_ra>
// kernel: dblock_forward.1
= control target key start
LH: loop header
LB: loop body
LE: loop exit
PB: predicated region body
PF: predicated region fallthrough
CT: control target
= control target key end

     0   :  { %v1260_v3 = vmov 0.0   ;;  %vm788_vm1 = vcmask 1045504   ;;  %vm645_vm2 = vcmask 1046528   ;;  %vm924_vm3 = vcmask 523264   ;;  %s2098_s1 = inlined_call_operand.vmem [shape: f32[3,128,256], index: 1, kind: input, shape index: {}]   ;;  %s2099_s0 = inlined_call_operand.vmem [shape: f32[2,8,128], index: 0, kind: input, shape index: {}]   ;;  %s2100_s4 = inlined_call_operand.vmem [shape: f32[128,64], index: 4, kind: input, shape index: {}]   ;;  %s2101_s3 = inlined_call_operand.vmem [shape: f32[3,256,64], index: 3, kind: input, shape index: {}]   ;;  %s2102_s2 = inlined_call_operand.vmem [shape: f32[1,256], index: 2, kind: input, shape index: {}]   ;;  %s2103_s5 = inlined_call_operand.vmem [shape: f32[1,64], index: 5, kind: input, shape index: {}]   ;;  %s2104_s6 = inlined_call_operand.vmem [shape: f32[16,64], index: 6, kind: output, shape index: {}]  }
   0x1   :  { %v962_v0 = vld [vmem:[%s2098_s1 + $0x1f8] sm:$0xff]  ;;  %v961_v2 = vld [vmem:[%s2098_s1 + $0x1f0] sm:$0xff]  ;;  %182 = vmatprep.mubr.f32.mxu0 %v1260_v3  ;;  %41 = vst [vmem:[#allocation2] sm:$0x1] %v1260_v3  ;;  %42 = vst [vmem:[#allocation2 + $0x10] sm:$0x1] %v1260_v3  ;;  %259 = vmatprep.mubr.f32.mxu1 %v1260_v3 }
   0x2   :  { %v82_v1 = vld [vmem:[%s2098_s1 + $0xf8] sm:$0xff]  ;;  %43 = vst [vmem:[#allocation2 + $0x9] sm:$0x1] %v1260_v3  ;;  %44 = vst [vmem:[#allocation2 + $0x19] sm:$0x1] %v1260_v3  ;;  %118 = vmatprep.subr.mxu0 %v962_v0  ;;  %v81_v4 = vld [vmem:[%s2098_s1 + $0xf0] sm:$0xff] }
   0x3   :  { %195 = vmatprep.subr.mxu1 %v82_v1  ;;  %v960_v5 = vld [vmem:[%s2098_s1 + $0x1e8] sm:$0xff]  ;;  %119 = vmatpush1.msra.mxu0 %v961_v2  ;;  %v959_v7 = vld [vmem:[%s2098_s1 + $0x1e0] sm:$0xff]  ;;  %v958_v9 = vld [vmem:[%s2098_s1 + $0x1d8] sm:$0xff] }
   0x4   :  { %v80_v6 = vld [vmem:[%s2098_s1 + $0xe8] sm:$0xff]  ;;  %196 = vmatpush1.msra.mxu1 %v81_v4  ;;  %v79_v8 = vld [vmem:[%s2098_s1 + $0xe0] sm:$0xff]  ;;  %120 = vmatprep.subr.mxu0 %v960_v5  ;;  %v78_v10 = vld [vmem:[%s2098_s1 + $0xd8] sm:$0xff] }
   0x5   :  { %197 = vmatprep.subr.mxu1 %v80_v6  ;;  %v957_v11 = vld [vmem:[%s2098_s1 + $0x1d0] sm:$0xff]  ;;  %121 = vmatpush1.msra.mxu0 %v959_v7  ;;  %v956_v13 = vld [vmem:[%s2098_s1 + $0x1c8] sm:$0xff]  ;;  %v955_v15 = vld [vmem:[%s2098_s1 + $0x1c0] sm:$0xff] }
   0x6   :  { %v77_v12 = vld [vmem:[%s2098_s1 + $0xd0] sm:$0xff]  ;;  %198 = vmatpush1.msra.mxu1 %v79_v8  ;;  %v76_v14 = vld [vmem:[%s2098_s1 + $0xc8] sm:$0xff]  ;;  %122 = vmatprep.subr.mxu0 %v958_v9  ;;  %v75_v16 = vld [vmem:[%s2098_s1 + $0xc0] sm:$0xff] }
   0x7   :  { %199 = vmatprep.subr.mxu1 %v78_v10  ;;  %123 = vmatpush1.msra.mxu0 %v957_v11  ;;  %v954_v17 = vld [vmem:[%s2098_s1 + $0x1b8] sm:$0xff]  ;;  %v953_v19 = vld [vmem:[%s2098_s1 + $0x1b0] sm:$0xff]  ;;  %v952_v21 = vld [vmem:[%s2098_s1 + $0x1a8] sm:$0xff] }
   0x8   :  { %200 = vmatpush1.msra.mxu1 %v77_v12  ;;  %v74_v18 = vld [vmem:[%s2098_s1 + $0xb8] sm:$0xff]  ;;  %124 = vmatprep.subr.mxu0 %v956_v13  ;;  %v73_v20 = vld [vmem:[%s2098_s1 + $0xb0] sm:$0xff]  ;;  %v72_v22 = vld [vmem:[%s2098_s1 + $0xa8] sm:$0xff] }
   0x9   :  { %201 = vmatprep.subr.mxu1 %v76_v14  ;;  %125 = vmatpush1.msra.mxu0 %v955_v15  ;;  %v951_v23 = vld [vmem:[%s2098_s1 + $0x1a0] sm:$0xff]  ;;  %v950_v25 = vld [vmem:[%s2098_s1 + $0x198] sm:$0xff]  ;;  %v949_v27 = vld [vmem:[%s2098_s1 + $0x190] sm:$0xff] }
   0xa   :  { %202 = vmatpush1.msra.mxu1 %v75_v16  ;;  %126 = vmatprep.subr.mxu0 %v954_v17  ;;  %v71_v24 = vld [vmem:[%s2098_s1 + $0xa0] sm:$0xff]  ;;  %v70_v26 = vld [vmem:[%s2098_s1 + $0x98] sm:$0xff]  ;;  %v69_v28 = vld [vmem:[%s2098_s1 + $0x90] sm:$0xff] }
   0xb   :  { %203 = vmatprep.subr.mxu1 %v74_v18  ;;  %127 = vmatpush1.msra.mxu0 %v953_v19  ;;  %v948_v29 = vld [vmem:[%s2098_s1 + $0x188] sm:$0xff]  ;;  %v947_v31 = vld [vmem:[%s2098_s1 + $0x180] sm:$0xff]  ;;  %v946_v33 = vld [vmem:[%s2098_s1 + $0x178] sm:$0xff] }
   0xc   :  { %204 = vmatpush1.msra.mxu1 %v73_v20  ;;  %128 = vmatprep.subr.mxu0 %v952_v21  ;;  %v68_v30 = vld [vmem:[%s2098_s1 + $0x88] sm:$0xff]  ;;  %v67_v32 = vld [vmem:[%s2098_s1 + $0x80] sm:$0xff]  ;;  %v66_v34 = vld [vmem:[%s2098_s1 + $0x78] sm:$0xff] }
   0xd   :  { %205 = vmatprep.subr.mxu1 %v72_v22  ;;  %129 = vmatpush1.msra.mxu0 %v951_v23  ;;  %v945_v35 = vld [vmem:[%s2098_s1 + $0x170] sm:$0xff]  ;;  %v944_v37 = vld [vmem:[%s2098_s1 + $0x168] sm:$0xff]  ;;  %v943_v39 = vld [vmem:[%s2098_s1 + $0x160] sm:$0xff] }
   0xe   :  { %206 = vmatpush1.msra.mxu1 %v71_v24  ;;  %130 = vmatprep.subr.mxu0 %v950_v25  ;;  %v65_v36 = vld [vmem:[%s2098_s1 + $0x70] sm:$0xff]  ;;  %v64_v38 = vld [vmem:[%s2098_s1 + $0x68] sm:$0xff]  ;;  %v63_v40 = vld [vmem:[%s2098_s1 + $0x60] sm:$0xff] }
   0xf   :  { %207 = vmatprep.subr.mxu1 %v70_v26  ;;  %131 = vmatpush1.msra.mxu0 %v949_v27  ;;  %v942_v41 = vld [vmem:[%s2098_s1 + $0x158] sm:$0xff]  ;;  %v941_v43 = vld [vmem:[%s2098_s1 + $0x150] sm:$0xff]  ;;  %v940_v45 = vld [vmem:[%s2098_s1 + $0x148] sm:$0xff] }
  0x10   :  { %208 = vmatpush1.msra.mxu1 %v69_v28  ;;  %132 = vmatprep.subr.mxu0 %v948_v29  ;;  %v62_v42 = vld [vmem:[%s2098_s1 + $0x58] sm:$0xff]  ;;  %v61_v44 = vld [vmem:[%s2098_s1 + $0x50] sm:$0xff]  ;;  %v60_v46 = vld [vmem:[%s2098_s1 + $0x48] sm:$0xff] }
  0x11   :  { %209 = vmatprep.subr.mxu1 %v68_v30  ;;  %133 = vmatpush1.msra.mxu0 %v947_v31  ;;  %v939_v47 = vld [vmem:[%s2098_s1 + $0x140] sm:$0xff]  ;;  %v938_v50 = vld [vmem:[%s2098_s1 + $0x138] sm:$0xff]  ;;  %v937_v53 = vld [vmem:[%s2098_s1 + $0x130] sm:$0xff] }
  0x12   :  { %210 = vmatpush1.msra.mxu1 %v67_v32  ;;  %134 = vmatprep.subr.mxu0 %v946_v33  ;;  %v59_v48 = vld [vmem:[%s2098_s1 + $0x40] sm:$0xff]  ;;  %v58_v51 = vld [vmem:[%s2098_s1 + $0x38] sm:$0xff]  ;;  %v57_v54 = vld [vmem:[%s2098_s1 + $0x30] sm:$0xff] }
  0x13   :  { %211 = vmatprep.subr.mxu1 %v66_v34  ;;  %135 = vmatpush1.msra.mxu0 %v945_v35  ;;  %v1449_v49 = vld [vmem:[%s2099_s0] sm:$0xff]  ;;  %v936_v55 = vld [vmem:[%s2098_s1 + $0x128] sm:$0xff]  ;;  %v934_v59 = vld [vmem:[%s2098_s1 + $0x118] sm:$0xff] }
  0x14   :  { %212 = vmatpush1.msra.mxu1 %v65_v36  ;;  %136 = vmatprep.subr.mxu0 %v944_v37  ;;  %v45_v52 = vmax.f32 %v1449_v49, 0.0  ;;  %v56_v56 = vld [vmem:[%s2098_s1 + $0x28] sm:$0xff]  ;;  %v935_v57 = vld [vmem:[%s2098_s1 + $0x120] sm:$0xff]  ;;  %v54_v60 = vld [vmem:[%s2098_s1 + $0x18] sm:$0xff] }
  0x15   :  { %213 = vmatprep.subr.mxu1 %v64_v38  ;;  %137 = vmatpush1.msra.mxu0 %v943_v39  ;;  %v55_v58 = vld [vmem:[%s2098_s1 + $0x20] sm:$0xff]  ;;  %v933_v61 = vld [vmem:[%s2098_s1 + $0x110] sm:$0xff]  ;;  %v932_v63 = vld [vmem:[%s2098_s1 + $0x108] sm:$0xff] }
  0x16   :  { %214 = vmatpush1.msra.mxu1 %v63_v40  ;;  %138 = vmatprep.subr.mxu0 %v942_v41  ;;  %47 = vst [vmem:[#allocation2 + $0x1] sm:$0xff] %v45_v52  ;;  %v53_v62 = vld [vmem:[%s2098_s1 + $0x10] sm:$0xff]  ;;  %v52_v0 = vld [vmem:[%s2098_s1 + $0x8] sm:$0xff]  ;;  %v931_v1 = vld [vmem:[%s2098_s1 + $0x100] sm:$0xff] }
  0x17   :  { %215 = vmatprep.subr.mxu1 %v62_v42  ;;  %139 = vmatpush1.msra.mxu0 %v941_v43  ;;  %v51_v2 = vld [vmem:[%s2098_s1] sm:$0xff]  ;;  %v1503_v4 = vld [vmem:[%s2099_s0 + $0x8] sm:$0xff]  ;;  %v994_v6 = vld [vmem:[%s2098_s1 + $0x2f8] sm:$0xff] }
  0x18   :  { %216 = vmatpush1.msra.mxu1 %v61_v44  ;;  %140 = vmatprep.subr.mxu0 %v940_v45  ;;  %v46_v7 = vmax.f32 %v1503_v4, 0.0  ;;  %v993_v8 = vld [vmem:[%s2098_s1 + $0x2f0] sm:$0xff]  ;;  %v992_v9 = vld [vmem:[%s2098_s1 + $0x2e8] sm:$0xff]  ;;  %v991_v10 = vld [vmem:[%s2098_s1 + $0x2e0] sm:$0xff] }
  0x19   :  { %217 = vmatprep.subr.mxu1 %v60_v46  ;;  %141 = vmatpush1.msra.mxu0 %v939_v47  ;;  %v990_v11 = vld [vmem:[%s2098_s1 + $0x2d8] sm:$0xff]  ;;  %v989_v12 = vld [vmem:[%s2098_s1 + $0x2d0] sm:$0xff]  ;;  %v988_v13 = vld [vmem:[%s2098_s1 + $0x2c8] sm:$0xff] }
  0x1a   :  { %218 = vmatpush1.msra.mxu1 %v59_v48  ;;  %142 = vmatprep.subr.mxu0 %v938_v50  ;;  %48 = vst [vmem:[#allocation2 + $0x11] sm:$0xff] %v46_v7  ;;  %v987_v14 = vld [vmem:[%s2098_s1 + $0x2c0] sm:$0xff]  ;;  %v986_v15 = vld [vmem:[%s2098_s1 + $0x2b8] sm:$0xff]  ;;  %v985_v16 = vld [vmem:[%s2098_s1 + $0x2b0] sm:$0xff] }
  0x1b   :  { %219 = vmatprep.subr.mxu1 %v58_v51  ;;  %143 = vmatpush1.msra.mxu0 %v937_v53  ;;  %v984_v18 = vld [vmem:[%s2098_s1 + $0x2a8] sm:$0xff]  ;;  %v983_v19 = vld [vmem:[%s2098_s1 + $0x2a0] sm:$0xff]  ;;  %v982_v20 = vld [vmem:[%s2098_s1 + $0x298] sm:$0xff] }
  0x1c   :  { %220 = vmatpush1.msra.mxu1 %v57_v54  ;;  %144 = vmatprep.subr.mxu0 %v936_v55  ;;  %v981_v21 = vld [vmem:[%s2098_s1 + $0x290] sm:$0xff]  ;;  %v980_v22 = vld [vmem:[%s2098_s1 + $0x288] sm:$0xff]  ;;  %v979_v23 = vld [vmem:[%s2098_s1 + $0x280] sm:$0xff] }
  0x1d   :  { %221 = vmatprep.subr.mxu1 %v56_v56  ;;  %145 = vmatpush1.msra.mxu0 %v935_v57  ;;  %v49_v5 = vld [vmem:[#allocation2] sm:$0xff]  ;;  %v978_v24 = vld [vmem:[%s2098_s1 + $0x278] sm:$0xff]  ;;  %v977_v25 = vld [vmem:[%s2098_s1 + $0x270] sm:$0xff] }
  0x1e   :  { %222 = vmatpush1.msra.mxu1 %v55_v58  ;;  %146 = vmatprep.subr.mxu0 %v934_v59  ;;  %v976_v26 = vld [vmem:[%s2098_s1 + $0x268] sm:$0xff]  ;;  %v975_v27 = vld [vmem:[%s2098_s1 + $0x260] sm:$0xff]  ;;  %v974_v28 = vld [vmem:[%s2098_s1 + $0x258] sm:$0xff] }
  0x1f   :  { %223 = vmatprep.subr.mxu1 %v54_v60  ;;  %147 = vmatpush1.msra.mxu0 %v933_v61  ;;  %v973_v29 = vld [vmem:[%s2098_s1 + $0x250] sm:$0xff]  ;;  %v972_v30 = vld [vmem:[%s2098_s1 + $0x248] sm:$0xff]  ;;  %v971_v31 = vld [vmem:[%s2098_s1 + $0x240] sm:$0xff] }
  0x20   :  { %224 = vmatpush1.msra.mxu1 %v53_v62  ;;  %148 = vmatprep.subr.mxu0 %v932_v63  ;;  %v970_v32 = vld [vmem:[%s2098_s1 + $0x238] sm:$0xff]  ;;  %v969_v33 = vld [vmem:[%s2098_s1 + $0x230] sm:$0xff]  ;;  %v968_v34 = vld [vmem:[%s2098_s1 + $0x228] sm:$0xff] }
  0x21   :  { %225 = vmatprep.subr.mxu1 %v52_v0  ;;  %149 = vmatpush1.msra.mxu0 %v931_v1  ;;  %v50_v17 = vld [vmem:[#allocation2 + $0x10] sm:$0xff]  ;;  %v967_v35 = vld [vmem:[%s2098_s1 + $0x220] sm:$0xff]  ;;  %v966_v36 = vld [vmem:[%s2098_s1 + $0x218] sm:$0xff] }
  0x22   :  { %226 = vmatpush1.msra.mxu1 %v51_v2  ;;  %183 = vmatmul.mubr.f32.vlgmr.msra.gmra.mxu0 %v45_v52  ;;  %v965_v37 = vld [vmem:[%s2098_s1 + $0x210] sm:$0xff]  ;;  %v964_v38 = vld [vmem:[%s2098_s1 + $0x208] sm:$0xff]  ;;  %v963_v39 = vld [vmem:[%s2098_s1 + $0x200] sm:$0xff] }
  0x23   :  { %260 = vmatmul.mubr.f32.vlgmr.msra.gmra.mxu1 %v49_v5  ;;  %307 = vmatprep.subr.mxu0 %v994_v6  ;;  %v272_v40 = vld [vmem:[#allocation2 + $0x2] sm:$0xff]  ;;  %v40_v41 = vld [vmem:[%s2100_s4 + $0x78] sm:$0xff]  ;;  %v39_v42 = vld [vmem:[%s2100_s4 + $0x70] sm:$0xff] }
  0x24   :  { %188 = vmatprep.mubr.f32.mxu0 %v1260_v3  ;;  %308 = vmatpush1.msra.mxu0 %v993_v8  ;;  %v273_v43 = vld [vmem:[#allocation2 + $0x12] sm:$0xff]  ;;  %v38_v44 = vld [vmem:[%s2100_s4 + $0x68] sm:$0xff]  ;;  %v37_v45 = vld [vmem:[%s2100_s4 + $0x60] sm:$0xff] }
  0x25   :  { %265 = vmatprep.mubr.f32.mxu1 %v1260_v3  ;;  %309 = vmatprep.subr.mxu0 %v992_v9  ;;  %v36_v46 = vld [vmem:[%s2100_s4 + $0x58] sm:$0xff]  ;;  %v35_v47 = vld [vmem:[%s2100_s4 + $0x50] sm:$0xff]  ;;  %v34_v48 = vld [vmem:[%s2100_s4 + $0x48] sm:$0xff] }
  0x26   :  { %310 = vmatpush1.msra.mxu0 %v991_v10  ;;  %v33_v50 = vld [vmem:[%s2100_s4 + $0x40] sm:$0xff]  ;;  %v478_v51 = vld [vmem:[%s2101_s3 + $0xf8] sm:$0xff]  ;;  %v477_v53 = vld [vmem:[%s2101_s3 + $0xf0] sm:$0xff] }
  0x27   :  { %311 = vmatprep.subr.mxu0 %v990_v11  ;;  %189 = vmatmul.mubr.f32.gmra.mxu0 %v46_v7  ;;  %v462_v52 = vld [vmem:[%s2101_s3 + $0x78] sm:$0xff]  ;;  %v31_v54 = vld [vmem:[%s2100_s4 + $0x30] sm:$0xff]  ;;  %v476_v56 = vld [vmem:[%s2101_s3 + $0xe8] sm:$0xff] }
  0x28   :  { %312 = vmatpush1.msra.mxu0 %v989_v12  ;;  %371 = vmatprep.mubr.f32.mxu0 %v1260_v3  ;;  %v461_v55 = vld [vmem:[%s2101_s3 + $0x70] sm:$0xff]  ;;  %v460_v57 = vld [vmem:[%s2101_s3 + $0x68] sm:$0xff]  ;;  %v475_v59 = vld [vmem:[%s2101_s3 + $0xe0] sm:$0xff] }
  0x29   :  { %313 = vmatprep.subr.mxu0 %v988_v13  ;;  %266 = vmatmul.mubr.f32.gmra.mxu1 %v50_v17  ;;  %v30_v58 = vld [vmem:[%s2100_s4 + $0x28] sm:$0xff]  ;;  %v459_v60 = vld [vmem:[%s2101_s3 + $0x60] sm:$0xff]  ;;  %v474_v62 = vld [vmem:[%s2101_s3 + $0xd8] sm:$0xff] }
  0x2a   :  { %314 = vmatpush1.msra.mxu0 %v987_v14  ;;  %1060 = vmatprep.subr.mxu1 %v478_v51  ;;  %v29_v61 = vld [vmem:[%s2100_s4 + $0x20] sm:$0xff]  ;;  %v458_v63 = vld [vmem:[%s2101_s3 + $0x58] sm:$0xff]  ;;  %v473_v1 = vld [vmem:[%s2101_s3 + $0xd0] sm:$0xff] }
  0x2b   :  { %315 = vmatprep.subr.mxu0 %v986_v15  ;;  %1061 = vmatpush3.msra.mxu1 %v462_v52  ;;  %v28_v0 = vld [vmem:[%s2100_s4 + $0x18] sm:$0xff]  ;;  %v457_v2 = vld [vmem:[%s2101_s3 + $0x50] sm:$0xff]  ;;  %v472_v6 = vld [vmem:[%s2101_s3 + $0xc8] sm:$0xff] }
  0x2c   :  { %316 = vmatpush1.msra.mxu0 %v985_v16  ;;  %1062 = vmatprep.subr.mxu1 %v477_v53  ;;  %v27_v5 = vld [vmem:[%s2100_s4 + $0x10] sm:$0xff]  ;;  %v26_v7 = vld [vmem:[%s2100_s4 + $0x8] sm:$0xff]  ;;  %v25_v8 = vld [vmem:[%s2100_s4] sm:$0xff] }
  0x2d   :  { %317 = vmatprep.subr.mxu0 %v984_v18  ;;  %1063 = vmatpush3.msra.mxu1 %v461_v55  ;;  %v1697_v9 = vld [vmem:[%s2101_s3 + $0x2f8] sm:$0xff]  ;;  %v1707_v11 = vld [vmem:[%s2101_s3 + $0x2f0] sm:$0xff]  ;;  %v1720_v13 = vld [vmem:[%s2101_s3 + $0x2e8] sm:$0xff] }
  0x2e   :  { %318 = vmatpush1.msra.mxu0 %v983_v19  ;;  %1064 = vmatprep.subr.mxu1 %v476_v56  ;;  %v1702_v10 = vld [vmem:[%s2101_s3 + $0x278] sm:$0xff]  ;;  %v1714_v12 = vld [vmem:[%s2101_s3 + $0x270] sm:$0xff]  ;;  %v1726_v14 = vld [vmem:[%s2101_s3 + $0x268] sm:$0xff] }
  0x2f   :  { %319 = vmatprep.subr.mxu0 %v982_v20  ;;  %1065 = vmatpush3.msra.mxu1 %v460_v57  ;;  %v1738_v15 = vld [vmem:[%s2101_s3 + $0x260] sm:$0xff]  ;;  %v1744_v16 = vld [vmem:[%s2101_s3 + $0x2d8] sm:$0xff]  ;;  %v456_v17 = vld [vmem:[%s2101_s3 + $0x48] sm:$0xff] }
  0x30   :  { %320 = vmatpush1.msra.mxu0 %v981_v21  ;;  %1066 = vmatprep.subr.mxu1 %v475_v59  ;;  %v1755_v18 = vld [vmem:[%s2101_s3 + $0x258] sm:$0xff]  ;;  %v471_v19 = vld [vmem:[%s2101_s3 + $0xc0] sm:$0xff]  ;;  %v1764_v20 = vld [vmem:[%s2101_s3 + $0x2d0] sm:$0xff] }
  0x31   :  { %321 = vmatprep.subr.mxu0 %v980_v22  ;;  %1067 = vmatpush3.msra.mxu1 %v459_v60  ;;  %v455_v21 = vld [vmem:[%s2101_s3 + $0x40] sm:$0xff]  ;;  %v1773_v22 = vld [vmem:[%s2101_s3 + $0x250] sm:$0xff]  ;;  %v1026_v55 = vld [vmem:[%s2101_s3 + $0x1f8] sm:$0xff] }
  0x32   :  { %322 = vmatpush1.msra.mxu0 %v979_v23  ;;  %1068 = vmatprep.subr.mxu1 %v474_v62  ;;  %v470_v23 = vld [vmem:[%s2101_s3 + $0xb8] sm:$0xff]  ;;  %v463_v51 = vld [vmem:[%s2101_s3 + $0x80] sm:$0xff]  ;;  %v1913_v52 = vld [vmem:[%s2101_s3 + $0x290] sm:$0xff] }
  0x33   :  { %323 = vmatprep.subr.mxu0 %v978_v24  ;;  %1069 = vmatpush3.msra.mxu1 %v458_v63  ;;  %v1782_v24 = vld [vmem:[%s2101_s3 + $0x2c8] sm:$0xff]  ;;  %v447_v53 = vld [vmem:[%s2101_s3] sm:$0xff] }
  0x34   :  { %324 = vmatpush1.msra.mxu0 %v977_v25  ;;  %1070 = vmatprep.subr.mxu1 %v473_v1  ;;  %v390_v25 = vlaneseq  ;;  %v1931_v56 = vld [vmem:[%s2101_s3 + $0x288] sm:$0xff]  ;;  %v1949_v59 = vld [vmem:[%s2101_s3 + $0x200] sm:$0xff] }
  0x35   :  { %325 = vmatprep.subr.mxu0 %v976_v26  ;;  %1071 = vmatpush3.msra.mxu1 %v457_v2  ;;  %v454_v26 = vld [vmem:[%s2101_s3 + $0x38] sm:$0xff]  ;;  %v1937_v57 = vld [vmem:[%s2101_s3 + $0x208] sm:$0xff] }
  0x36   :  { %326 = vmatpush1.msra.mxu0 %v975_v27  ;;  %1072 = vmatprep.subr.mxu1 %v472_v6  ;;  %v1791_v27 = vld [vmem:[%s2101_s3 + $0x248] sm:$0xff]  ;;  %vm410_vm0 = vcmp.lt.s32.totalorder %v390_v25, 256 }
  0x37   :  { %327 = vmatprep.subr.mxu0 %v974_v28  ;;  %1073 = vmatpush3.msra.mxu1 %v456_v17  ;;  %v469_v28 = vld [vmem:[%s2101_s3 + $0xb0] sm:$0xff]  ;;  %412 = vst.msk [vmem:[#allocation3] ss:$8 sm:$0x3] %vm410_vm0, %v1260_v3 }
  0x38   :  { %328 = vmatpush1.msra.mxu0 %v973_v29  ;;  %1074 = vmatprep.subr.mxu1 %v471_v19  ;;  %v1800_v29 = vld [vmem:[%s2101_s3 + $0x2c0] sm:$0xff]  ;;  %415 = vst.msk [vmem:[#allocation3 + $0x20] ss:$8 sm:$0x3] %vm410_vm0, %v1260_v3 }
  0x39   :  { %329 = vmatprep.subr.mxu0 %v972_v30  ;;  %1075 = vmatpush3.msra.mxu1 %v455_v21  ;;  %v453_v30 = vld [vmem:[%s2101_s3 + $0x30] sm:$0xff]  ;;  %418 = vst.msk [vmem:[#allocation3 + $0x11] ss:$8 sm:$0x3] %vm410_vm0, %v1260_v3 }
  0x3a   :  { %330 = vmatpush1.msra.mxu0 %v971_v31  ;;  %1076 = vmatprep.subr.mxu1 %v470_v23  ;;  %v1810_v31 = vld [vmem:[%s2101_s3 + $0x240] sm:$0xff]  ;;  %421 = vst.msk [vmem:[#allocation3 + $0x31] ss:$8 sm:$0x3] %vm410_vm0, %v1260_v3 }
  0x3b   :  { %331 = vmatprep.subr.mxu0 %v970_v32  ;;  %1077 = vmatpush3.msra.mxu1 %v454_v26  ;;  %v468_v32 = vld [vmem:[%s2101_s3 + $0xa8] sm:$0xff] }
  0x3c   :  { %332 = vmatpush1.msra.mxu0 %v969_v33  ;;  %1078 = vmatprep.subr.mxu1 %v469_v28  ;;  %v1823_v33 = vld [vmem:[%s2101_s3 + $0x2b8] sm:$0xff] }
  0x3d   :  { %333 = vmatprep.subr.mxu0 %v968_v34  ;;  %1079 = vmatpush3.msra.mxu1 %v453_v30  ;;  %v452_v34 = vld [vmem:[%s2101_s3 + $0x28] sm:$0xff] }
  0x3e   :  { %334 = vmatpush1.msra.mxu0 %v967_v35  ;;  %1080 = vmatprep.subr.mxu1 %v468_v32  ;;  %v467_v35 = vld [vmem:[%s2101_s3 + $0xa0] sm:$0xff] }
  0x3f   :  { %335 = vmatprep.subr.mxu0 %v966_v36  ;;  %1081 = vmatpush3.msra.mxu1 %v452_v34  ;;  %v1841_v36 = vld [vmem:[%s2101_s3 + $0x2b0] sm:$0xff] }
  0x40   :  { %336 = vmatpush1.msra.mxu0 %v965_v37  ;;  %1082 = vmatprep.subr.mxu1 %v467_v35  ;;  %v451_v37 = vld [vmem:[%s2101_s3 + $0x20] sm:$0xff] }
  0x41   :  { %337 = vmatprep.subr.mxu0 %v964_v38  ;;  %v1850_v38 = vld [vmem:[%s2101_s3 + $0x230] sm:$0xff]  ;;  %1083 = vmatpush3.msra.mxu1 %v451_v37 }
  0x42   :  { %338 = vmatpush1.msra.mxu0 %v963_v39  ;;  %v466_v39 = vld [vmem:[%s2101_s3 + $0x98] sm:$0xff] }
  0x43   :  { %372 = vmatmul.mubr.f32.vlgmr.msra.gmra.mxu0 %v272_v40  ;;  %1192 = vmatprep.subr.mxu0 %v40_v41  ;;  %v1859_v40 = vld [vmem:[%s2101_s3 + $0x2a8] sm:$0xff] }
  0x44   :  { %377 = vmatprep.mubr.f32.mxu0 %v1260_v3  ;;  %1193 = vmatpush3.msra.mxu0 %v40_v41  ;;  %v1832_v3 = vld [vmem:[%s2101_s3 + $0x238] sm:$0xff] }
  0x45   :  { %1194 = vmatprep.subr.mxu0 %v39_v42  ;;  %1084 = vmatprep.subr.mxu1 %v466_v39  ;;  %v450_v41 = vld [vmem:[%s2101_s3 + $0x18] sm:$0xff] }
  0x46   :  { %1195 = vmatpush3.msra.mxu0 %v39_v42  ;;  %v1868_v42 = vld [vmem:[%s2101_s3 + $0x228] sm:$0xff]  ;;  %1085 = vmatpush3.msra.mxu1 %v450_v41 }
  0x47   :  { %378 = vmatmul.mubr.f32.gmra.mxu0 %v273_v43  ;;  %1196 = vmatprep.subr.mxu0 %v38_v44  ;;  %v465_v43 = vld [vmem:[%s2101_s3 + $0x90] sm:$0xff] }
  0x48   :  { %1197 = vmatpush3.msra.mxu0 %v38_v44  ;;  %1224 = vmatprep.mubr.f32.mxu0 %v1449_v49  ;;  %v32_v49 = vld [vmem:[%s2100_s4 + $0x38] sm:$0xff]  ;;  %v1877_v44 = vld [vmem:[%s2101_s3 + $0x2a0] sm:$0xff] }
  0x49   :  { %1198 = vmatprep.subr.mxu0 %v37_v45  ;;  %1086 = vmatprep.subr.mxu1 %v465_v43 }
  0x4a   :  { %1199 = vmatpush3.msra.mxu0 %v37_v45  ;;  %v449_v45 = vld [vmem:[%s2101_s3 + $0x10] sm:$0xff] }
  0x4b   :  { %1200 = vmatprep.subr.mxu0 %v36_v46  ;;  %1087 = vmatpush3.msra.mxu1 %v449_v45 }
  0x4c   :  { %1201 = vmatpush3.msra.mxu0 %v36_v46  ;;  %v1886_v46 = vld [vmem:[%s2101_s3 + $0x220] sm:$0xff] }
  0x4d   :  { %1202 = vmatprep.subr.mxu0 %v35_v47 }
  0x4e   :  { %1203 = vmatpush3.msra.mxu0 %v35_v47  ;;  %v464_v47 = vld [vmem:[%s2101_s3 + $0x88] sm:$0xff] }
  0x4f   :  { %1204 = vmatprep.subr.mxu0 %v34_v48  ;;  %1088 = vmatprep.subr.mxu1 %v464_v47 }
  0x50   :  { %1205 = vmatpush3.msra.mxu0 %v34_v48  ;;  %v1895_v48 = vld [vmem:[%s2101_s3 + $0x298] sm:$0xff] }
  0x51   :  { %1206 = vmatprep.subr.mxu0 %v33_v50 }
  0x52   :  { %1207 = vmatpush3.msra.mxu0 %v33_v50  ;;  %v448_v50 = vld [vmem:[%s2101_s3 + $0x8] sm:$0xff] }
  0x53   :  { %1208 = vmatprep.subr.mxu0 %v32_v49  ;;  %1089 = vmatpush3.msra.mxu1 %v448_v50 }
  0x54   :  { %1209 = vmatpush3.msra.mxu0 %v32_v49  ;;  %v1904_v49 = vld [vmem:[%s2101_s3 + $0x218] sm:$0xff]  ;;  %1090 = vmatprep.subr.mxu1 %v463_v51 }
  0x55   :  { %1210 = vmatprep.subr.mxu0 %v31_v54  ;;  %1091 = vmatpush3.msra.mxu1 %v447_v53 }
  0x56   :  { %1211 = vmatpush3.msra.mxu0 %v31_v54  ;;  %v1921_v54 = vld [vmem:[%s2101_s3 + $0x210] sm:$0xff]  ;;  %1116 = vmatprep.subr.mxu1 %v1026_v55 }
  0x57   :  { %1212 = vmatprep.subr.mxu0 %v30_v58 }
  0x58   :  { %1213 = vmatpush3.msra.mxu0 %v30_v58  ;;  %v1943_v58 = vld [vmem:[%s2101_s3 + $0x280] sm:$0xff] }
  0x59   :  { %1214 = vmatprep.subr.mxu0 %v29_v61 }
  0x5a   :  { %1215 = vmatpush3.msra.mxu0 %v29_v61  ;;  %v391_v61 = vshrl.u32 %v390_v25, 7 }
  0x5b   :  { %1216 = vmatprep.subr.mxu0 %v28_v0 }
  0x5c   :  { %1217 = vmatpush3.msra.mxu0 %v28_v0  ;;  %v392_v1 = vsub.s32 0, %v391_v61  ;;  %v396_v6 = vsub.s32 1, %v391_v61 }
  0x5d   :  { %1218 = vmatprep.subr.mxu0 %v27_v5 }
  0x5e   :  { %1219 = vmatpush3.msra.mxu0 %v27_v5  ;;  %v388_v5 = vld [vmem:[%s2102_s2] sm:$0x3] }
  0x5f   :  { %1220 = vmatprep.subr.mxu0 %v26_v7  ;;  %v393_v19 = vrot.slane %v388_v5, %v392_v1  ;;  %v397_v28 = vrot.slane %v388_v5, %v396_v6 }
  0x60   :  { %1221 = vmatpush3.msra.mxu0 %v26_v7 }
  0x61   :  { %1222 = vmatprep.subr.mxu0 %v25_v8 }
  0x62   :  { %1223 = vmatpush3.msra.mxu0 %v25_v8 }
  0x63   :  { %1154 = vmatprep.subr.mxu0 %v1697_v9  ;;  %1225 = vmatmul.mubr.f32.vlgmr.msra.gmra.mxu0 %v1503_v4  ;;  %v1732_v4 = vld [vmem:[%s2101_s3 + $0x2e0] sm:$0xff] }
  0x64   :  { %1155 = vmatpush3.msra.mxu0 %v1702_v10 }
  0x65   :  { %1156 = vmatprep.subr.mxu0 %v1707_v11 }
  0x66   :  { %1157 = vmatpush3.msra.mxu0 %v1714_v12 }
  0x67   :  { %1158 = vmatprep.subr.mxu0 %v1720_v13 }
  0x68   :  { %1159 = vmatpush3.msra.mxu0 %v1726_v14 }
  0x69   :  { %1160 = vmatprep.subr.mxu0 %v1732_v4 }
  0x6a   :  { %1161 = vmatpush3.msra.mxu0 %v1738_v15 }
  0x6b   :  { %1162 = vmatprep.subr.mxu0 %v1744_v16 }
  0x6c   :  { %1163 = vmatpush3.msra.mxu0 %v1755_v18 }
  0x6d   :  { %1164 = vmatprep.subr.mxu0 %v1764_v20 }
  0x6e   :  { %1165 = vmatpush3.msra.mxu0 %v1773_v22 }
  0x6f   :  { %1166 = vmatprep.subr.mxu0 %v1782_v24 }
  0x70   :  { %1167 = vmatpush3.msra.mxu0 %v1791_v27 }
  0x71   :  { %1168 = vmatprep.subr.mxu0 %v1800_v29 }
  0x72   :  { %1169 = vmatpush3.msra.mxu0 %v1810_v31 }
  0x73   :  { %1170 = vmatprep.subr.mxu0 %v1823_v33 }
  0x74   :  { %1171 = vmatpush3.msra.mxu0 %v1832_v3 }
  0x75   :  { %1172 = vmatprep.subr.mxu0 %v1841_v36 }
  0x76   :  { %1173 = vmatpush3.msra.mxu0 %v1850_v38 }
  0x77   :  { %1174 = vmatprep.subr.mxu0 %v1859_v40 }
  0x78   :  { %1175 = vmatpush3.msra.mxu0 %v1868_v42 }
  0x79   :  { %1176 = vmatprep.subr.mxu0 %v1877_v44 }
  0x7a   :  { %1177 = vmatpush3.msra.mxu0 %v1886_v46 }
  0x7b   :  { %1178 = vmatprep.subr.mxu0 %v1895_v48 }
  0x7c   :  { %1179 = vmatpush3.msra.mxu0 %v1904_v49 }
  0x7d   :  { %1180 = vmatprep.subr.mxu0 %v1913_v52 }
  0x7e   :  { %1181 = vmatpush3.msra.mxu0 %v1921_v54 }
  0x7f   :  { %1182 = vmatprep.subr.mxu0 %v1931_v56 }
  0x80   :  { %1183 = vmatpush3.msra.mxu0 %v1937_v57 }
  0x81   :  { %1184 = vmatprep.subr.mxu0 %v1943_v58 }
  0x82   :  { %1185 = vmatpush3.msra.mxu0 %v1949_v59 }
  0xe2   :  { %v184_v60 = vpop.f32.mrf.mxu0 }
  0xe3   :  { %v261_v62 = vpop.f32.mrf.mxu1 }
  0xe4   :  { %v186_v63 = vpop.f32.mrf.mxu0  ;;  %v262_v17 = vadd.f32 %v261_v62, %v184_v60 }
  0xe5   :  { %v263_v2 = vpop.f32.mrf.mxu1 }
  0xe6   :  { %v264_v23 = vadd.f32 %v263_v2, %v186_v63 }
  0xe7   :  { %v190_v0 = vpop.f32.mrf.mxu0 }
  0xe9   :  { %v267_v7 = vpop.f32.mrf.mxu1  ;;  %v192_v8 = vpop.f32.mrf.mxu0 }
  0xea   :  { %v268_v32 = vadd.f32 %v267_v7, %v190_v0  ;;  %v1010_v7 = vld [vmem:[%s2101_s3 + $0x178] sm:$0xff] }
  0xeb   :  { %v269_v30 = vpop.f32.mrf.mxu1 }
  0xec   :  { %v270_v39 = vadd.f32 %v269_v30, %v192_v8  ;;  %v1025_v8 = vld [vmem:[%s2101_s3 + $0x1f0] sm:$0xff] }
 0x103   :  { %v373_v21 = vpop.f32.mrf.mxu0 }
 0x104   :  { %v384_v26 = vadd.f32 %v373_v21, %v262_v17 }
 0x105   :  { %v375_v25 = vpop.f32.mrf.mxu0 }
 0x106   :  { %v400_v34 = vadd.f32 %v393_v19, %v384_v26  ;;  %v385_v35 = vadd.f32 %v375_v25, %v264_v23 }
 0x107   :  { %v379_v37 = vpop.f32.mrf.mxu0 }
 0x108   :  { %v404_v41 = vmax.f32 %v400_v34, 0.0  ;;  %v401_v43 = vadd.f32 %v397_v28, %v385_v35  ;;  %v386_v45 = vadd.f32 %v379_v37, %v268_v32  ;;  %v1009_v34 = vld [vmem:[%s2101_s3 + $0x170] sm:$0xff]  ;;  %v1024_v37 = vld [vmem:[%s2101_s3 + $0x1e8] sm:$0xff] }
 0x109   :  { %v381_v47 = vpop.f32.mrf.mxu0 }
 0x10a   :  { %v427_v50 = vrot.slane %v404_v41, 7  ;;  %v405_v51 = vmax.f32 %v401_v43, 0.0  ;;  %v402_v53 = vadd.f32 %v393_v19, %v386_v45  ;;  %v387_v55 = vadd.f32 %v381_v47, %v270_v39  ;;  %v1008_v47 = vld [vmem:[%s2101_s3 + $0x168] sm:$0xff] }
 0x10c   :  { %435 = vst [vmem:[#allocation3] sm:$0xfe] %v427_v50  ;;  %437 = vst [vmem:[#allocation3 + $0x10] sm:$0x1] %v427_v50  ;;  %v428_v60 = vrot.slane %v405_v51, 7  ;;  %v406_v61 = vmax.f32 %v402_v53, 0.0  ;;  %v403_v62 = vadd.f32 %v397_v28, %v387_v55 }
 0x10d   :  { %v1023_v51 = vld [vmem:[%s2101_s3 + $0x1e0] sm:$0xff] }
 0x10e   :  { %436 = vst [vmem:[#allocation3 + $0x8] sm:$0xfe] %v428_v60  ;;  %438 = vst [vmem:[#allocation3 + $0x18] sm:$0x1] %v428_v60  ;;  %v429_v63 = vrot.slane %v406_v61, 7  ;;  %v407_v0 = vmax.f32 %v403_v62, 0.0 }
 0x10f   :  { %v1007_v55 = vld [vmem:[%s2101_s3 + $0x160] sm:$0xff]  ;;  %v1022_v60 = vld [vmem:[%s2101_s3 + $0x1d8] sm:$0xff]  ;;  %v1021_v62 = vld [vmem:[%s2101_s3 + $0x1d0] sm:$0xff] }
 0x110   :  { %439 = vst [vmem:[#allocation3 + $0x20] sm:$0xfe] %v429_v63  ;;  %441 = vst [vmem:[#allocation3 + $0x30] sm:$0x1] %v429_v63  ;;  %v430_v1 = vrot.slane %v407_v0, 7  ;;  %v1006_v61 = vld [vmem:[%s2101_s3 + $0x158] sm:$0xff] }
 0x111   :  { %v1005_v63 = vld [vmem:[%s2101_s3 + $0x150] sm:$0xff]  ;;  %v1020_v0 = vld [vmem:[%s2101_s3 + $0x1c8] sm:$0xff] }
 0x112   :  { %440 = vst [vmem:[#allocation3 + $0x28] sm:$0xfe] %v430_v1  ;;  %442 = vst [vmem:[#allocation3 + $0x38] sm:$0x1] %v430_v1  ;;  %v1004_v1 = vld [vmem:[%s2101_s3 + $0x148] sm:$0xff] }
 0x113   :  { %v772_v2 = vld [vmem:[#allocation3] sm:$0xfc]  ;;  %v774_v5 = vld [vmem:[#allocation3 + $0x10] sm:$0x3] }
 0x114   :  { %v443_v6 = vld [vmem:[#allocation3] sm:$0xff]  ;;  %v789_v17 = vrot.slane %v772_v2, 2  ;;  %v790_v26 = vrot.slane %v774_v5, 2 }
 0x115   :  { %v444_v19 = vld [vmem:[#allocation3 + $0x8] sm:$0xff]  ;;  %v775_v23 = vld [vmem:[#allocation3 + $0x18] sm:$0x3]  ;;  %v1019_v2 = vld [vmem:[%s2101_s3 + $0x1c0] sm:$0xff] }
 0x116   :  { %v773_v21 = vld [vmem:[#allocation3 + $0x8] sm:$0xfc]  ;;  %543 = vmatprep.mubr.f32.mxu1 %v444_v19  ;;  %v793_v30 = vrot.slane %v775_v23, 2  ;;  %v632_v32 = vld [vmem:[#allocation3 + $0x18] sm:$0x1]  ;;  %v791_v45 = vsel %vm788_vm1, %v789_v17, %v790_v26  ;;  %v1003_v5 = vld [vmem:[%s2101_s3 + $0x140] sm:$0xff] }
 0x117   :  { %v792_v28 = vrot.slane %v773_v21, 2  ;;  %v630_v25 = vld [vmem:[#allocation3 + $0x8] sm:$0xfe]  ;;  %544 = vmatmul.mubr.f32.vlgmr.msra.gmra.mxu1 %v443_v6  ;;  %v650_v41 = vrot.slane %v632_v32, 1  ;;  %v445_v50 = vld [vmem:[#allocation3 + $0x20] sm:$0xff]  ;;  %v1018_v6 = vld [vmem:[%s2101_s3 + $0x1b8] sm:$0xff] }
 0x118   :  { %1117 = vmatpush3.msra.mxu1 %v1010_v7  ;;  %v649_v39 = vrot.slane %v630_v25, 1  ;;  %v1002_v7 = vld [vmem:[%s2101_s3 + $0x138] sm:$0xff]  ;;  %v1001_v17 = vld [vmem:[%s2101_s3 + $0x130] sm:$0xff]  ;;  %v1016_v19 = vld [vmem:[%s2101_s3 + $0x1a8] sm:$0xff] }
 0x119   :  { %v794_v35 = vsel %vm788_vm1, %v792_v28, %v793_v30  ;;  %1118 = vmatprep.subr.mxu1 %v1025_v8  ;;  %v446_v43 = vld [vmem:[#allocation3 + $0x28] sm:$0xff]  ;;  %v1017_v8 = vld [vmem:[%s2101_s3 + $0x1b0] sm:$0xff]  ;;  %v1015_v23 = vld [vmem:[%s2101_s3 + $0x1a0] sm:$0xff] }
 0x11a   :  { %902 = vmatprep.mubr.f32.mxu0 %v794_v35  ;;  %1119 = vmatpush3.msra.mxu1 %v1009_v34  ;;  %v651_v53 = vsel %vm645_vm2, %v649_v39, %v650_v41  ;;  %v1000_v21 = vld [vmem:[%s2101_s3 + $0x128] sm:$0xff]  ;;  %v999_v26 = vld [vmem:[%s2101_s3 + $0x120] sm:$0xff]  ;;  %v1014_v28 = vld [vmem:[%s2101_s3 + $0x198] sm:$0xff] }
 0x11b   :  { %548 = vmatprep.mubr.f32.mxu1 %v446_v43  ;;  %1120 = vmatprep.subr.mxu1 %v1024_v37  ;;  %v998_v30 = vld [vmem:[%s2101_s3 + $0x118] sm:$0xff]  ;;  %v1013_v25 = vld [vmem:[%s2101_s3 + $0x190] sm:$0xff]  ;;  %v629_v34 = vld [vmem:[#allocation3] sm:$0xfe] }
 0x11c   :  { %903 = vmatmul.mubr.f32.vlgmr.msra.gmra.mxu0 %v791_v45  ;;  %549 = vmatmul.mubr.f32.gmra.mxu1 %v445_v50  ;;  %v997_v32 = vld [vmem:[%s2101_s3 + $0x110] sm:$0xff]  ;;  %v1012_v37 = vld [vmem:[%s2101_s3 + $0x188] sm:$0xff]  ;;  %v636_v41 = vld [vmem:[#allocation3 + $0x38] sm:$0x1]  ;;  %v646_v50 = vrot.slane %v629_v34, 1 }
 0x11d   :  { %1121 = vmatpush3.msra.mxu1 %v1008_v47  ;;  %759 = vmatprep.mubr.f32.mxu1 %v651_v53  ;;  %v631_v35 = vld [vmem:[#allocation3 + $0x10] sm:$0x1]  ;;  %v634_v39 = vld [vmem:[#allocation3 + $0x28] sm:$0xfe]  ;;  %v1011_v45 = vld [vmem:[%s2101_s3 + $0x180] sm:$0xff] }
 0x11e   :  { %1122 = vmatprep.subr.mxu1 %v1023_v51  ;;  %v996_v43 = vld [vmem:[%s2101_s3 + $0x108] sm:$0xff]  ;;  %v995_v47 = vld [vmem:[%s2101_s3 + $0x100] sm:$0xff]  ;;  %v647_v51 = vrot.slane %v631_v35, 1  ;;  %v655_v53 = vrot.slane %v634_v39, 1 }
 0x11f   :  { %1123 = vmatpush3.msra.mxu1 %v1007_v55  ;;  %v656_v55 = vrot.slane %v636_v41, 1 }
 0x120   :  { %1124 = vmatprep.subr.mxu1 %v1022_v60  ;;  %v633_v60 = vld [vmem:[#allocation3 + $0x20] sm:$0xfe] }
 0x121   :  { %1125 = vmatpush3.msra.mxu1 %v1006_v61  ;;  %v635_v61 = vld [vmem:[#allocation3 + $0x30] sm:$0x1] }
 0x122   :  { %1126 = vmatprep.subr.mxu1 %v1021_v62  ;;  %v777_v62 = vld [vmem:[#allocation3 + $0x28] sm:$0xfc] }
 0x123   :  { %1127 = vmatpush3.msra.mxu1 %v1005_v63  ;;  %v779_v63 = vld [vmem:[#allocation3 + $0x38] sm:$0x3] }
 0x124   :  { %1128 = vmatprep.subr.mxu1 %v1020_v0  ;;  %v648_v0 = vsel %vm645_vm2, %v646_v50, %v647_v51 }
 0x125   :  { %1129 = vmatpush3.msra.mxu1 %v1004_v1  ;;  %v652_v1 = vrot.slane %v633_v60, 1 }
 0x126   :  { %1130 = vmatprep.subr.mxu1 %v1019_v2  ;;  %v653_v2 = vrot.slane %v635_v61, 1 }
 0x127   :  { %1131 = vmatpush3.msra.mxu1 %v1003_v5  ;;  %v657_v5 = vsel %vm645_vm2, %v655_v53, %v656_v55 }
 0x128   :  { %1132 = vmatprep.subr.mxu1 %v1018_v6  ;;  %v798_v6 = vrot.slane %v777_v62, 2 }
 0x129   :  { %1133 = vmatpush3.msra.mxu1 %v1002_v7  ;;  %v799_v7 = vrot.slane %v779_v63, 2 }
 0x12a   :  { %1134 = vmatprep.subr.mxu1 %v1017_v8  ;;  %v654_v8 = vsel %vm645_vm2, %v652_v1, %v653_v2 }
 0x12b   :  { %1135 = vmatpush3.msra.mxu1 %v1001_v17  ;;  %v800_v17 = vsel %vm788_vm1, %v798_v6, %v799_v7 }
 0x12c   :  { %1136 = vmatprep.subr.mxu1 %v1016_v19 }
 0x12d   :  { %1137 = vmatpush3.msra.mxu1 %v1000_v21 }
 0x12e   :  { %1138 = vmatprep.subr.mxu1 %v1015_v23 }
 0x12f   :  { %1139 = vmatpush3.msra.mxu1 %v999_v26 }
 0x130   :  { %1140 = vmatprep.subr.mxu1 %v1014_v28 }
 0x131   :  { %1141 = vmatpush3.msra.mxu1 %v998_v30 }
 0x132   :  { %1142 = vmatprep.subr.mxu1 %v1013_v25 }
 0x133   :  { %1143 = vmatpush3.msra.mxu1 %v997_v32 }
 0x134   :  { %1144 = vmatprep.subr.mxu1 %v1012_v37 }
 0x135   :  { %1145 = vmatpush3.msra.mxu1 %v996_v43 }
 0x136   :  { %1146 = vmatprep.subr.mxu1 %v1011_v45 }
 0x137   :  { %1147 = vmatpush3.msra.mxu1 %v995_v47 }
 0x138   :  { %760 = vmatmul.mubr.f32.vlgmr.msra.gmra.mxu1 %v648_v0  ;;  %1227 = vmatprep.subr.mxu1 %v1697_v9  ;;  %v776_v9 = vld [vmem:[#allocation3 + $0x20] sm:$0xfc] }
 0x139   :  { %764 = vmatprep.mubr.f32.mxu1 %v657_v5  ;;  %1243 = vmatpush3.msra.mxu1 %v1702_v10  ;;  %v778_v10 = vld [vmem:[#allocation3 + $0x30] sm:$0x3] }
 0x13a   :  { %1228 = vmatprep.subr.mxu1 %v1707_v11  ;;  %v795_v11 = vrot.slane %v776_v9, 2 }
 0x13b   :  { %1244 = vmatpush3.msra.mxu1 %v1714_v12  ;;  %v796_v12 = vrot.slane %v778_v10, 2 }
 0x13c   :  { %765 = vmatmul.mubr.f32.gmra.mxu1 %v654_v8  ;;  %1229 = vmatprep.subr.mxu1 %v1720_v13 }
 0x13d   :  { %1245 = vmatpush3.msra.mxu1 %v1726_v14  ;;  %907 = vmatprep.mubr.f32.mxu1 %v800_v17  ;;  %v797_v13 = vsel %vm788_vm1, %v795_v11, %v796_v12 }
 0x13e   :  { %1230 = vmatprep.subr.mxu1 %v1732_v4  ;;  %v1226_v4 = vpop.f32.mrf.mxu0 }
 0x13f   :  { %1246 = vmatpush3.msra.mxu1 %v1738_v15 }
 0x140   :  { %1231 = vmatprep.subr.mxu1 %v1744_v16  ;;  %v620_v16 = vpop.f32.mrf.mxu0 }
 0x141   :  { %1247 = vmatpush3.msra.mxu1 %v1755_v18 }
 0x142   :  { %1232 = vmatprep.subr.mxu1 %v1764_v20 }
 0x143   :  { %1248 = vmatpush3.msra.mxu1 %v1773_v22 }
 0x144   :  { %1233 = vmatprep.subr.mxu1 %v1782_v24 }
 0x145   :  { %1249 = vmatpush3.msra.mxu1 %v1791_v27 }
 0x146   :  { %1234 = vmatprep.subr.mxu1 %v1800_v29 }
 0x147   :  { %1250 = vmatpush3.msra.mxu1 %v1810_v31 }
 0x148   :  { %1235 = vmatprep.subr.mxu1 %v1823_v33 }
 0x149   :  { %1251 = vmatpush3.msra.mxu1 %v1832_v3 }
 0x14a   :  { %1236 = vmatprep.subr.mxu1 %v1841_v36 }
 0x14b   :  { %1252 = vmatpush3.msra.mxu1 %v1850_v38 }
 0x14c   :  { %1237 = vmatprep.subr.mxu1 %v1859_v40  ;;  %v1059_v40 = vld [vmem:[%s2103_s5] ss:$0 sm:$0xff] }
 0x14d   :  { %1253 = vmatpush3.msra.mxu1 %v1868_v42 }
 0x14e   :  { %1238 = vmatprep.subr.mxu1 %v1877_v44 }
 0x14f   :  { %1254 = vmatpush3.msra.mxu1 %v1886_v46 }
 0x150   :  { %1239 = vmatprep.subr.mxu1 %v1895_v48 }
 0x151   :  { %1255 = vmatpush3.msra.mxu1 %v1904_v49 }
 0x152   :  { %1240 = vmatprep.subr.mxu1 %v1913_v52 }
 0x153   :  { %1256 = vmatpush3.msra.mxu1 %v1921_v54 }
 0x154   :  { %1241 = vmatprep.subr.mxu1 %v1931_v56 }
 0x155   :  { %1257 = vmatpush3.msra.mxu1 %v1937_v57 }
 0x156   :  { %1242 = vmatprep.subr.mxu1 %v1943_v58 }
 0x157   :  { %1258 = vmatpush3.msra.mxu1 %v1949_v59 }
 0x158   :  { %908 = vmatmul.mubr.f32.vlgmr.msra.gmra.mxu1 %v797_v13 }
 0x1d7   :  { %v1092_v14 = vpop.f32.mrf.mxu1 }
 0x1d9   :  { %v1093_v15 = vpop.f32.mrf.mxu1 }
 0x1da   :  { %v1094_v24 = vadd.f32 %v1093_v15, %v1092_v14 }
 0x1dc   :  { %v1095_v18 = vpop.f32.mrf.mxu1  ;;  %v1186_v20 = vpop.f32.mrf.mxu0  ;;  %v621_v33 = vadd.f32 %v1094_v24, %v620_v16 }
 0x1de   :  { %v1096_v22 = vpop.f32.mrf.mxu1  ;;  %v1187_v29 = vpop.f32.mrf.mxu0 }
 0x1df   :  { %v1188_v36 = vadd.f32 %v1187_v29, %v1186_v20  ;;  %v1097_v49 = vadd.f32 %v1096_v22, %v1095_v18 }
 0x1e1   :  { %v626_v56 = vadd.f32 %v1226_v4, %v1097_v49 }
 0x1f8   :  { %v1148_v27 = vpop.f32.mrf.mxu1 }
 0x1fa   :  { %v1149_v31 = vpop.f32.mrf.mxu1 }
 0x1fb   :  { %v1150_v3 = vadd.f32 %v1149_v31, %v1148_v27 }
 0x1fc   :  { %v1151_v46 = vpop.f32.mrf.mxu1 }
 0x1fd   :  { %v770_v38 = vadd.f32 %v1150_v3, %v621_v33 }
 0x1fe   :  { %v1152_v48 = vpop.f32.mrf.mxu1 }
 0x1ff   :  { %v913_v42 = vadd.f32 %v1188_v36, %v770_v38  ;;  %v1153_v52 = vadd.f32 %v1152_v48, %v1151_v46 }
 0x201   :  { %v922_v44 = vadd.f32 %v1059_v40, %v913_v42  ;;  %v771_v58 = vadd.f32 %v1153_v52, %v626_v56 }
 0x203   :  { %925 = vst.msk [vmem:[%s2104_s6] sm:$0xff] %vm924_vm3, %v922_v44 }
 0x218   :  { %v1189_v54 = vpop.f32.mrf.mxu1 }
 0x21a   :  { %v1190_v57 = vpop.f32.mrf.mxu1 }
 0x21b   :  { %v1191_v59 = vadd.f32 %v1190_v57, %v1189_v54 }
 0x21d   :  { %v914_v19 = vadd.f32 %v1191_v59, %v771_v58 }
 0x21f   :  { %v923_v21 = vadd.f32 %v1059_v40, %v914_v19 }
 0x221   :  { %926 = vst.msk [vmem:[%s2104_s6 + $0x8] sm:$0xff] %vm924_vm3, %v923_v21 }

</bundles_post_ra>
